<compile_context>
chip_gen: v5e
topology: v5e:2x2
jax: 0.10.0
libtpu: 0.0.40
codegen_flags: <defaults>
</compile_context>

<pallas_src>
import functools

import jax
import jax.numpy as jnp
from jax.experimental import pallas as pl
from jax.experimental.pallas import tpu as pltpu

_CHUNK_ROWS = 256                 # batch rows per in-kernel compute chunk
_MAX_BLOCK_ROWS = 8192            # batch rows per DMA block (grid step)
_SMALL_B = 512                    # below this many images, plain XLA wins
_VMEM_LIMIT_BYTES = 32 * 1024 * 1024


def _round_up(x, m):
    return ((x + m - 1) // m) * m


def _pool_out_size(size, kernel, stride, ceil_mode):
    """PyTorch MaxPool2d output-size rule (padding=0, dilation=1)."""
    if ceil_mode:
        out = -(-(size - kernel) // stride) + 1     # ceil div
        if (out - 1) * stride >= size:              # last window must start inside input
            out -= 1
    else:
        out = (size - kernel) // stride + 1
    return out


def _min_value(dtype):
    if jnp.issubdtype(dtype, jnp.floating):
        return jnp.asarray(-jnp.inf, dtype)
    return jnp.asarray(jnp.iinfo(dtype).min, dtype)


def _maxpool_kernel(x_ref, o_ref, *, ksize, stride, h, w, oh, ow, chunk):
    """Batch-on-sublane max pool.

    x_ref: (TB, H*W)   o_ref: (TB, OH*OW)
    Spatial positions live on the lane axis; each pooling window is the max of
    a masked cross-lane reduce.  Compute is strip-mined over `chunk`-row
    slices to keep vreg pressure low while the DMA block stays large.
    """
    hw = h * w
    neg = _min_value(x_ref.dtype)

    # Static lane masks for each window, built from contiguous per-row lane
    # ranges (no integer div/mod needed).  Hoisted out of the chunk loop.
    lane = jax.lax.broadcasted_iota(jnp.int32, (1, hw), 1)
    masks = []
    for i in range(oh):
        h0 = i * stride
        h1 = min(h0 + ksize, h)          # ceil_mode: clip partial window at edge
        for j in range(ow):
            w0 = j * stride
            w1 = min(w0 + ksize, w)
            m = None
            for hh in range(h0, h1):
                lo = hh * w + w0
                hi = hh * w + w1
                part = (lane >= lo) & (lane < hi)
                m = part if m is None else (m | part)
            masks.append(m)

    n_chunks = x_ref.shape[0] // chunk

    def body(ci, carry):
        r0 = pl.multiple_of(ci * chunk, chunk)
        xs = x_ref[pl.ds(r0, chunk), :]
        # One masked cross-lane max per window (XLU work; free in an HBM-bound
        # kernel).  Concatenate the 4 columns and store once.
        cols = [jnp.max(jnp.where(m, xs, neg), axis=-1, keepdims=True) for m in masks]
        o_ref[pl.ds(r0, chunk), :] = jnp.concatenate(cols, axis=-1)
        return carry

    jax.lax.fori_loop(0, n_chunks, body, 0)


def _maxpool_xla(x_nchw, kernel_size=3, stride=None, ceil_mode=True):
    """Pure-JAX path (torch.nn.MaxPool2d semantics).  Used as reference and as
    the fast path for tiny batches, where a kernel launch is pure overhead."""
    if stride is None:
        stride = kernel_size
    n, c, h, w = x_nchw.shape
    oh = _pool_out_size(h, kernel_size, stride, ceil_mode)
    ow = _pool_out_size(w, kernel_size, stride, ceil_mode)
    cols = []
    for i in range(oh):
        for j in range(ow):
            h0, h1 = i * stride, min(i * stride + kernel_size, h)
            w0, w1 = j * stride, min(j * stride + kernel_size, w)
            cols.append(jnp.max(x_nchw[:, :, h0:h1, w0:w1], axis=(2, 3)))
    return jnp.stack(cols, axis=-1).reshape(n, c, oh, ow)


def maxpool2d(x_nchw, kernel_size=3, stride=None, ceil_mode=True, *, force_pallas=False):
    """MaxPool2d(kernel_size, stride=kernel_size, padding=0, ceil_mode) on NCHW."""
    if stride is None:
        stride = kernel_size
    n, c, h, w = x_nchw.shape
    oh = _pool_out_size(h, kernel_size, stride, ceil_mode)
    ow = _pool_out_size(w, kernel_size, stride, ceil_mode)
    b = n * c

    if b < _SMALL_B and not force_pallas:
        # Tiny batch: padding + kernel launch are 100% overhead; let XLA fuse it.
        return _maxpool_xla(x_nchw, kernel_size, stride, ceil_mode)

    itemsize = jnp.dtype(x_nchw.dtype).itemsize
    sub = 8 * max(1, 4 // itemsize)      # sublane granularity for this dtype

    # Natural layout: (N,C,H,W) -> (B, H*W) is a free contiguous reshape
    # (no HBM transpose pass on either side of the kernel).
    x = x_nchw.reshape(b, h * w)

    # --- tile selection -------------------------------------------------
    chunk = min(_CHUNK_ROWS, _round_up(b, sub))
    rows_c = _round_up(b, chunk)
    n_chunks = rows_c // chunk
    cpb = min(max(1, _MAX_BLOCK_ROWS // chunk), n_chunks)
    # Keep >=2 grid steps when there is enough work: shards across v7x's two
    # TensorCores and lets the DMA pipeline overlap on all generations.
    if n_chunks >= 4 and -(-n_chunks // cpb) < 2:
        cpb = -(-n_chunks // 2)
    tb = cpb * chunk
    b_pad = _round_up(b, tb)
    if b_pad != b:
        x = jnp.pad(x, ((0, b_pad - b), (0, 0)))

    kern = functools.partial(
        _maxpool_kernel, ksize=kernel_size, stride=stride,
        h=h, w=w, oh=oh, ow=ow, chunk=chunk,
    )

    out = pl.pallas_call(
        kern,
        out_shape=jax.ShapeDtypeStruct((b_pad, oh * ow), x.dtype),
        grid=(b_pad // tb,),
        in_specs=[pl.BlockSpec((tb, h * w), lambda g: (g, 0))],
        out_specs=pl.BlockSpec((tb, oh * ow), lambda g: (g, 0)),
        compiler_params=pltpu.CompilerParams(
            dimension_semantics=("parallel",),
            vmem_limit_bytes=_VMEM_LIMIT_BYTES,
        ),
    )(x)

    # Drop the padded batch rows (keep this slice: padded rows hold garbage).
    return out[:b].reshape(n, c, oh, ow)


if __name__ == "__main__":
    key = jax.random.PRNGKey(0)

    # Mirrors `input = torch.reshape(input, (-1, 1, 5, 5))`: batch=2, C=1, 5x5.
    x = jax.random.normal(key, (2 * 1 * 5 * 5,), dtype=jnp.float32).reshape(-1, 1, 5, 5)
    ref = _maxpool_xla(x, kernel_size=3, stride=3, ceil_mode=True)

    # Small-batch dispatch (fused-XLA fast path).
    out = jax.block_until_ready(maxpool2d(x, kernel_size=3, stride=3, ceil_mode=True))
    assert out.shape == (2, 1, 2, 2), out.shape
    assert jnp.allclose(out, ref), (out, ref)

    # Same tiny shape forced through the Pallas kernel (coverage of padding to
    # a single 8-row block).
    out_k = jax.block_until_ready(
        maxpool2d(x, kernel_size=3, stride=3, ceil_mode=True, force_pallas=True))
    assert jnp.allclose(out_k, ref), (out_k, ref)

    # Larger batch: exercises row padding, the chunked in-kernel loop and the
    # >=2-step parallel grid.
    key2 = jax.random.PRNGKey(1)
    x2 = jax.random.normal(key2, (3000, 1, 5, 5), dtype=jnp.float32)
    out2 = jax.block_until_ready(maxpool2d(x2, kernel_size=3, stride=3, ceil_mode=True))
    ref2 = _maxpool_xla(x2, kernel_size=3, stride=3, ceil_mode=True)
    assert out2.shape == (3000, 1, 2, 2), out2.shape
    assert jnp.allclose(out2, ref2)

    print("KERNEL_OK")
</pallas_src>

<mosaic_0001>
module attributes {stable_mosaic.version = 11 : i64} {
  func.func @_maxpool_kernel(%arg0: i32, %arg1: memref<8x25xf32, #tpu.memory_space<vmem>>, %arg2: memref<8x4xf32, #tpu.memory_space<vmem>>) attributes {dimension_semantics = [#tpu.dimension_semantics<parallel>], iteration_bounds = array<i64: 1>, scalar_prefetch = 0 : i64, scratch_operands = 0 : i64, tpu.core_type = #tpu.core_type<tc>, window_params = [{transform_indices = @transform_0, window_bounds = array<i64: 8, 25>}, {transform_indices = @transform_1, window_bounds = array<i64: 8, 4>}]} {
    %0 = tpu.iota {dimensions = array<i32: 1>} : vector<1x25xi32>
    %c0_i32 = arith.constant 0 : i32
    %1 = vector.broadcast %c0_i32 : i32 to vector<1x25xi32>
    %2 = arith.cmpi sge, %0, %1 : vector<1x25xi32>
    %c3_i32 = arith.constant 3 : i32
    %3 = vector.broadcast %c3_i32 : i32 to vector<1x25xi32>
    %4 = arith.cmpi slt, %0, %3 : vector<1x25xi32>
    %5 = arith.andi %2, %4 : vector<1x25xi1>
    %c5_i32 = arith.constant 5 : i32
    %6 = vector.broadcast %c5_i32 : i32 to vector<1x25xi32>
    %7 = arith.cmpi sge, %0, %6 : vector<1x25xi32>
    %c8_i32 = arith.constant 8 : i32
    %8 = vector.broadcast %c8_i32 : i32 to vector<1x25xi32>
    %9 = arith.cmpi slt, %0, %8 : vector<1x25xi32>
    %10 = arith.andi %7, %9 : vector<1x25xi1>
    %11 = arith.ori %5, %10 : vector<1x25xi1>
    %c10_i32 = arith.constant 10 : i32
    %12 = vector.broadcast %c10_i32 : i32 to vector<1x25xi32>
    %13 = arith.cmpi sge, %0, %12 : vector<1x25xi32>
    %c13_i32 = arith.constant 13 : i32
    %14 = vector.broadcast %c13_i32 : i32 to vector<1x25xi32>
    %15 = arith.cmpi slt, %0, %14 : vector<1x25xi32>
    %16 = arith.andi %13, %15 : vector<1x25xi1>
    %17 = arith.ori %11, %16 : vector<1x25xi1>
    %c3_i32_0 = arith.constant 3 : i32
    %18 = vector.broadcast %c3_i32_0 : i32 to vector<1x25xi32>
    %19 = arith.cmpi sge, %0, %18 : vector<1x25xi32>
    %c5_i32_1 = arith.constant 5 : i32
    %20 = vector.broadcast %c5_i32_1 : i32 to vector<1x25xi32>
    %21 = arith.cmpi slt, %0, %20 : vector<1x25xi32>
    %22 = arith.andi %19, %21 : vector<1x25xi1>
    %c8_i32_2 = arith.constant 8 : i32
    %23 = vector.broadcast %c8_i32_2 : i32 to vector<1x25xi32>
    %24 = arith.cmpi sge, %0, %23 : vector<1x25xi32>
    %c10_i32_3 = arith.constant 10 : i32
    %25 = vector.broadcast %c10_i32_3 : i32 to vector<1x25xi32>
    %26 = arith.cmpi slt, %0, %25 : vector<1x25xi32>
    %27 = arith.andi %24, %26 : vector<1x25xi1>
    %28 = arith.ori %22, %27 : vector<1x25xi1>
    %c13_i32_4 = arith.constant 13 : i32
    %29 = vector.broadcast %c13_i32_4 : i32 to vector<1x25xi32>
    %30 = arith.cmpi sge, %0, %29 : vector<1x25xi32>
    %c15_i32 = arith.constant 15 : i32
    %31 = vector.broadcast %c15_i32 : i32 to vector<1x25xi32>
    %32 = arith.cmpi slt, %0, %31 : vector<1x25xi32>
    %33 = arith.andi %30, %32 : vector<1x25xi1>
    %34 = arith.ori %28, %33 : vector<1x25xi1>
    %c15_i32_5 = arith.constant 15 : i32
    %35 = vector.broadcast %c15_i32_5 : i32 to vector<1x25xi32>
    %36 = arith.cmpi sge, %0, %35 : vector<1x25xi32>
    %c18_i32 = arith.constant 18 : i32
    %37 = vector.broadcast %c18_i32 : i32 to vector<1x25xi32>
    %38 = arith.cmpi slt, %0, %37 : vector<1x25xi32>
    %39 = arith.andi %36, %38 : vector<1x25xi1>
    %c20_i32 = arith.constant 20 : i32
    %40 = vector.broadcast %c20_i32 : i32 to vector<1x25xi32>
    %41 = arith.cmpi sge, %0, %40 : vector<1x25xi32>
    %c23_i32 = arith.constant 23 : i32
    %42 = vector.broadcast %c23_i32 : i32 to vector<1x25xi32>
    %43 = arith.cmpi slt, %0, %42 : vector<1x25xi32>
    %44 = arith.andi %41, %43 : vector<1x25xi1>
    %45 = arith.ori %39, %44 : vector<1x25xi1>
    %c18_i32_6 = arith.constant 18 : i32
    %46 = vector.broadcast %c18_i32_6 : i32 to vector<1x25xi32>
    %47 = arith.cmpi sge, %0, %46 : vector<1x25xi32>
    %c20_i32_7 = arith.constant 20 : i32
    %48 = vector.broadcast %c20_i32_7 : i32 to vector<1x25xi32>
    %49 = arith.cmpi slt, %0, %48 : vector<1x25xi32>
    %50 = arith.andi %47, %49 : vector<1x25xi1>
    %c23_i32_8 = arith.constant 23 : i32
    %51 = vector.broadcast %c23_i32_8 : i32 to vector<1x25xi32>
    %52 = arith.cmpi sge, %0, %51 : vector<1x25xi32>
    %c25_i32 = arith.constant 25 : i32
    %53 = vector.broadcast %c25_i32 : i32 to vector<1x25xi32>
    %54 = arith.cmpi slt, %0, %53 : vector<1x25xi32>
    %55 = arith.andi %52, %54 : vector<1x25xi1>
    %56 = arith.ori %50, %55 : vector<1x25xi1>
    %cst = arith.constant 0xFF800000 : f32
    %c0_i32_9 = arith.constant 0 : i32
    %c8_i32_10 = arith.constant 8 : i32
    %57 = arith.muli %c0_i32_9, %c8_i32_10 : i32
    %58 = tpu.assume_multiple %57, 8 : i32
    %59 = arith.index_cast %58 : i32 to index
    %c0 = arith.constant 0 : index
    %60 = vector.load %arg1[%59, %c0] : memref<8x25xf32, #tpu.memory_space<vmem>>, vector<8x25xf32>
    %61 = vector.shape_cast %17 : vector<1x25xi1> to vector<1x25xi1>
    %62 = vector.broadcast %61 : vector<1x25xi1> to vector<8x25xi1>
    %63 = vector.broadcast %cst : f32 to vector<8x25xf32>
    %64 = arith.select %62, %60, %63 : vector<8x25xi1>, vector<8x25xf32>
    %cst_11 = arith.constant dense<0xFF800000> : vector<8xf32>
    %65 = vector.multi_reduction <maximumf>, %64, %cst_11 [1] : vector<8x25xf32> to vector<8xf32>
    %66 = vector.shape_cast %65 : vector<8xf32> to vector<8x1xf32>
    %67 = vector.shape_cast %34 : vector<1x25xi1> to vector<1x25xi1>
    %68 = vector.broadcast %67 : vector<1x25xi1> to vector<8x25xi1>
    %69 = vector.broadcast %cst : f32 to vector<8x25xf32>
    %70 = arith.select %68, %60, %69 : vector<8x25xi1>, vector<8x25xf32>
    %cst_12 = arith.constant dense<0xFF800000> : vector<8xf32>
    %71 = vector.multi_reduction <maximumf>, %70, %cst_12 [1] : vector<8x25xf32> to vector<8xf32>
    %72 = vector.shape_cast %71 : vector<8xf32> to vector<8x1xf32>
    %73 = vector.shape_cast %45 : vector<1x25xi1> to vector<1x25xi1>
    %74 = vector.broadcast %73 : vector<1x25xi1> to vector<8x25xi1>
    %75 = vector.broadcast %cst : f32 to vector<8x25xf32>
    %76 = arith.select %74, %60, %75 : vector<8x25xi1>, vector<8x25xf32>
    %cst_13 = arith.constant dense<0xFF800000> : vector<8xf32>
    %77 = vector.multi_reduction <maximumf>, %76, %cst_13 [1] : vector<8x25xf32> to vector<8xf32>
    %78 = vector.shape_cast %77 : vector<8xf32> to vector<8x1xf32>
    %79 = vector.shape_cast %56 : vector<1x25xi1> to vector<1x25xi1>
    %80 = vector.broadcast %79 : vector<1x25xi1> to vector<8x25xi1>
    %81 = vector.broadcast %cst : f32 to vector<8x25xf32>
    %82 = arith.select %80, %60, %81 : vector<8x25xi1>, vector<8x25xf32>
    %cst_14 = arith.constant dense<0xFF800000> : vector<8xf32>
    %83 = vector.multi_reduction <maximumf>, %82, %cst_14 [1] : vector<8x25xf32> to vector<8xf32>
    %84 = vector.shape_cast %83 : vector<8xf32> to vector<8x1xf32>
    %85 = tpu.concatenate %66, %72, %78, %84 in 1 : vector<8x1xf32>, vector<8x1xf32>, vector<8x1xf32>, vector<8x1xf32> -> vector<8x4xf32>
    %86 = arith.index_cast %58 : i32 to index
    %c0_15 = arith.constant 0 : index
    %87 = vector.load %arg2[%86, %c0_15] : memref<8x4xf32, #tpu.memory_space<vmem>>, vector<8x4xf32>
    tpu.vector_store %arg2[%86, %c0_15], %85 {strides = array<i32>} : memref<8x4xf32, #tpu.memory_space<vmem>>, vector<8x4xf32>,
    %c1_i32 = arith.constant 1 : i32
    return
  }
  func.func @transform_0(%arg0: i32) -> (i32, i32) {
    %c0_i32 = arith.constant 0 : i32
    %c0_i32_0 = arith.constant 0 : i32
    return %arg0, %c0_i32 : i32, i32
  }
  func.func @transform_1(%arg0: i32) -> (i32, i32) {
    %c0_i32 = arith.constant 0 : i32
    %c0_i32_0 = arith.constant 0 : i32
    return %arg0, %c0_i32 : i32, i32
  }
}

</mosaic_0001>

<bundles_post_ra>
// kernel: tpu_custom_call.1
= control target key start
LH: loop header
LB: loop body
LE: loop exit
PB: predicated region body
PF: predicated region fallthrough
CT: control target
= control target key end

     0   :  { %6 = vsyncpa [#allocation3], 0  ;;  %s126_s9 = smov [#allocation2]   ;;  %s147_s0 = inlined_call_operand.hbm [shape: f32[8,25], index: 0, kind: input, shape index: {}]   ;;  %s148_s1 = inlined_call_operand.vmem [shape: f32[8,4], index: 1, kind: output, shape index: {}]  }
   0x1   :  { %s12_s8 = sshll.u32 %s147_s0, 4  ;;  %s14_s10 = sshll.u32 %s126_s9, 4  ;;  %s13_s8 = int_to_ptr.hbm [resolvable:$true] %s12_s8  ;;  %s15_s10 = int_to_ptr.vmem [resolvable:$true] %s14_s10 }
   0x2   :  { %17 = dma.hbm_to_vmem [thread:$0]  %s13_s8, 128, %s15_s10, [#allocation3]  }
   0x3   :  { %124 = dma.done.wait [#allocation3], 128  }
   0x4   :  { %125 = vsyncadd [#allocation3], 4294967168  ;;  %v22_v0 = vlaneseq  ;;  %v60_v2 = vld [vmem:[#allocation2] sm:$0xff]  ;;  %vm64_vm10 = vcmask 203776  }
   0x6   :  { %v23_v1 = vand.u32 127, %v22_v0 }
   0x8   :  { %vm25_vm0 = vcmp.lt.s32.totalorder %v23_v1, 3  ;;  %vm27_vm1 = vcmp.ge.s32.totalorder %v23_v1, 5  ;;  %vm28_vm2 = vcmp.lt.s32.totalorder %v23_v1, 8  ;;  %vm31_vm3 = vcmp.ge.s32.totalorder %v23_v1, 10 }
   0x9   :  { %vm29_vm4 = vmand %vm27_vm1, %vm28_vm2  ;;  %vm32_vm5 = vcmp.lt.s32.totalorder %v23_v1, 13  ;;  %vm46_vm7 = vcmp.ge.s32.totalorder %v23_v1, 15  ;;  %vm47_vm8 = vcmp.lt.s32.totalorder %v23_v1, 18  ;;  %vm49_vm11 = vcmp.ge.s32.totalorder %v23_v1, 20 }
   0xa   :  { %vm30_vm6 = vmor %vm25_vm0, %vm29_vm4  ;;  %vm50_vm12 = vcmp.lt.s32.totalorder %v23_v1, 23  ;;  %vm35_vm15 = vcmp.ge.s32.totalorder %v23_v1, 3  ;;  %vm36_vm1 = vcmp.lt.s32.totalorder %v23_v1, 5  ;;  %vm38_vm0 = vcmp.ge.s32.totalorder %v23_v1, 8 }
   0xb   :  { %vm33_vm9 = vmand %vm31_vm3, %vm32_vm5  ;;  %vm39_vm4 = vcmp.lt.s32.totalorder %v23_v1, 10 }
   0xc   :  { %vm34_vm13 = vmor %vm30_vm6, %vm33_vm9  ;;  %vm42_vm6 = vcmp.ge.s32.totalorder %v23_v1, 13  ;;  %vm43_vm9 = vcmp.lt.s32.totalorder %v23_v1, 15 }
   0xd   :  { %v63_v3 = vsel %vm34_vm13, %v60_v2, -inf  ;;  %vm48_vm14 = vmand %vm46_vm7, %vm47_vm8  ;;  %vm53_vm8 = vcmp.ge.s32.totalorder %v23_v1, 18 }
   0xe   :  { %v65_v4 = vsel %vm64_vm10, %v63_v3, -inf  ;;  %vm51_vm2 = vmand %vm49_vm11, %vm50_vm12  ;;  %vm54_vm11 = vcmp.lt.s32.totalorder %v23_v1, 20 }
   0xf   :  { %66 = vmax.xlane.f32.xlu0 %v65_v4  ;;  %vm52_vm3 = vmor %vm48_vm14, %vm51_vm2  ;;  %vm56_vm2 = vcmp.ge.s32.totalorder %v23_v1, 23  ;;  %vm57_vm14 = vcmp.lt.s32.totalorder %v23_v1, 25 }
  0x10   :  { %v76_v5 = vsel %vm52_vm3, %v60_v2, -inf  ;;  %vm37_vm5 = vmand %vm35_vm15, %vm36_vm1 }
  0x11   :  { %v77_v6 = vsel %vm64_vm10, %v76_v5, -inf  ;;  %vm40_vm13 = vmand %vm38_vm0, %vm39_vm4  ;;  %vm86_vm4 = vcmask 7168  }
  0x12   :  { %78 = vmax.xlane.f32.xlu1 %v77_v6  ;;  %vm41_vm7 = vmor %vm37_vm5, %vm40_vm13  ;;  %vm88_vm5 = vcmask 15360  }
  0x13   :  { %vm44_vm12 = vmand %vm42_vm6, %vm43_vm9  ;;  %vm90_vm6 = vcmask 23552   ;;  %vm92_vm9 = vcmask 31744  }
  0x14   :  { %vm45_vm3 = vmor %vm41_vm7, %vm44_vm12 }
  0x15   :  { %v70_v7 = vsel %vm45_vm3, %v60_v2, -inf  ;;  %vm55_vm1 = vmand %vm53_vm8, %vm54_vm11 }
  0x16   :  { %v71_v8 = vsel %vm64_vm10, %v70_v7, -inf  ;;  %vm58_vm15 = vmand %vm56_vm2, %vm57_vm14 }
  0x17   :  { %72 = vmax.xlane.f32.xlu0 %v71_v8  ;;  %vm59_vm0 = vmor %vm55_vm1, %vm58_vm15 }
  0x18   :  { %v82_v9 = vsel %vm59_vm0, %v60_v2, -inf }
  0x19   :  { %v83_v10 = vsel %vm64_vm10, %v82_v9, -inf }
  0x1a   :  { %84 = vmax.xlane.f32.xlu1 %v83_v10 }
  0x82   :  { %v67_v11 = vpop.xlane.xlu0 %66 }
  0x85   :  { %v79_v12 = vpop.xlane.xlu1 %78 }
  0x8a   :  { %v73_v13 = vpop.xlane.xlu0 %72 }
  0x8b   :  { %v87_v14 = vsel %vm86_vm4, %v67_v11, %v73_v13 }
  0x8c   :  { %v89_v15 = vsel %vm88_vm5, %v87_v14, %v79_v12 }
  0x8d   :  { %v85_v16 = vpop.xlane.xlu1 %84 }
  0x8e   :  { %v91_v17 = vsel %vm90_vm6, %v89_v15, %v85_v16 }
  0x8f   :  { %93 = vst.msk [vmem:[%s148_s1] sm:$0xff] %vm92_vm9, %v91_v17 }
  0x90   :  { %98 = vsyncpa [#allocation3], 1 }

</bundles_post_ra>
